<compile_context>
chip_gen: v7x
topology: tpu7x:2x2x1
jax: 0.10.0
libtpu: 0.0.40
codegen_flags: <defaults>
</compile_context>

<pallas_src>
import jax
import jax.numpy as jnp
from jax.experimental import pallas as pl
from jax.experimental.pallas import tpu as pltpu

# True (PyTorch) layer sizes.
D_IN, H1, H2, H3, D_OUT = 80, 300, 500, 300, 80


def _round_up(n, m):
    return ((n + m - 1) // m) * m


def _pad_for_300():
    """384 on 128x128-MXU generations (<= v5), 512 on 256x256-MXU (v6e / v7x)."""
    try:
        kind = jax.devices()[0].device_kind.lower()
    except Exception:
        return 512
    if "v6" in kind or "7" in kind:
        return 512
    return 384


# Lane/MXU-friendly padded sizes (all multiples of 128).
H1P = H3P = _pad_for_300()
H2P = 512
D_IN_PAD = 128
D_OUT_PAD = 128


def _pick_tb(B):
    """Batch tile: sublane-aligned, big enough to amortize grid-step overhead,
    and >= 2 grid steps for B > 256 so v7x's second TensorCore gets work."""
    if B <= 256:
        return max(8, _round_up(B, 8))
    return min(1024, _round_up(pl.cdiv(B, 2), 256))


def _make_mlp_kernel(num_chunks, chunk_rows):
    """4-layer MLP over a (TB, D_IN_PAD) tile, as `num_chunks` independent
    row-chunk chains unrolled in one body so MXU/VPU work interleaves."""

    def kernel(x_ref,
               w1_ref, b1_ref,
               w2_ref, b2_ref,
               w3_ref, b3_ref,
               w4_ref, b4_ref,
               o_ref):
        w1, b1 = w1_ref[...], b1_ref[...]
        w2, b2 = w2_ref[...], b2_ref[...]
        w3, b3 = w3_ref[...], b3_ref[...]
        w4, b4 = w4_ref[...], b4_ref[...]
        for c in range(num_chunks):                      # static unroll
            rows = pl.ds(c * chunk_rows, chunk_rows)     # static offsets
            x = x_ref[rows, :].astype(jnp.bfloat16)
            h = jnp.dot(x, w1, preferred_element_type=jnp.float32)
            h = jnp.maximum(h + b1, 0.0)
            h = jnp.dot(h.astype(jnp.bfloat16), w2,
                        preferred_element_type=jnp.float32)
            h = jnp.maximum(h + b2, 0.0)
            h = jnp.dot(h.astype(jnp.bfloat16), w3,
                        preferred_element_type=jnp.float32)
            h = jnp.maximum(h + b3, 0.0)
            h = jnp.dot(h.astype(jnp.bfloat16), w4,
                        preferred_element_type=jnp.float32)
            o_ref[rows, :] = (h + b4).astype(o_ref.dtype)  # lane-dense store

    return kernel


def elastic_forward(x, params, *, tb=None):
    """x: (B, 40, 2) float32.  Returns squeeze(unflatten(MLP(flatten(x))))."""
    B = x.shape[0]
    x_flat = x.reshape(B, D_IN)                                  # torch.flatten
    x_flat = jnp.pad(x_flat, ((0, 0), (0, D_IN_PAD - D_IN)))     # lane-dense K

    if tb is None:
        tb = _pick_tb(B)
    b_pad = _round_up(B, tb)
    if b_pad != B:
        x_flat = jnp.pad(x_flat, ((0, b_pad - B), (0, 0)))
    grid = (b_pad // tb,)

    # Two independent row-half chains when the tile is big enough (>=128 rows each).
    num_chunks = 2 if tb % 256 == 0 else 1
    chunk_rows = tb // num_chunks

    (w1, b1), (w2, b2), (w3, b3), (w4, b4) = params

    in_specs = [
        pl.BlockSpec((tb, D_IN_PAD), lambda i: (i, 0)),        # x tile (pipelined)
        pl.BlockSpec((D_IN_PAD, H1P), lambda i: (0, 0)),       # w1 (VMEM-resident)
        pl.BlockSpec((1, H1P), lambda i: (0, 0)),              # b1
        pl.BlockSpec((H1P, H2P), lambda i: (0, 0)),            # w2
        pl.BlockSpec((1, H2P), lambda i: (0, 0)),              # b2
        pl.BlockSpec((H2P, H3P), lambda i: (0, 0)),            # w3
        pl.BlockSpec((1, H3P), lambda i: (0, 0)),              # b3
        pl.BlockSpec((H3P, D_OUT_PAD), lambda i: (0, 0)),      # w4
        pl.BlockSpec((1, D_OUT_PAD), lambda i: (0, 0)),        # b4
    ]
    out_specs = pl.BlockSpec((tb, D_OUT_PAD), lambda i: (i, 0))

    flops = 2 * b_pad * (D_IN_PAD * H1P + H1P * H2P + H2P * H3P + H3P * D_OUT_PAD)
    weight_bytes = sum(int(a.size) * a.dtype.itemsize
                       for a in (w1, b1, w2, b2, w3, b3, w4, b4))
    bytes_accessed = (b_pad * D_IN_PAD * 4) + weight_bytes + (b_pad * D_OUT_PAD * 4)

    out_flat = pl.pallas_call(
        _make_mlp_kernel(num_chunks, chunk_rows),
        out_shape=jax.ShapeDtypeStruct((b_pad, D_OUT_PAD), jnp.float32),
        grid=grid,
        in_specs=in_specs,
        out_specs=out_specs,
        compiler_params=pltpu.CompilerParams(
            dimension_semantics=("parallel",)),
        cost_estimate=pl.CostEstimate(
            flops=flops, transcendentals=0, bytes_accessed=bytes_accessed),
    )(x_flat, w1, b1, w2, b2, w3, b3, w4, b4)

    out = out_flat[:B, :D_OUT].reshape(B, 40, 2)   # drop pad rows/cols, unflatten
    return jnp.squeeze(out)                        # torch .squeeze() semantics


def init_params(key):
    """nn.Linear-style U(-1/sqrt(fan_in)) init, true (unpadded) f32 shapes."""
    dims = [(D_IN, H1), (H1, H2), (H2, H3), (H3, D_OUT)]
    params = []
    for fi, fo in dims:
        key, kw, kb = jax.random.split(key, 3)
        bound = 1.0 / (fi ** 0.5)
        w = jax.random.uniform(kw, (fi, fo), jnp.float32, -bound, bound)
        b = jax.random.uniform(kb, (fo,), jnp.float32, -bound, bound)
        params.append((w, b))
    return params


def pack_params(params_f32):
    """Zero-pad to lane-dense shapes; weights (in,out) bf16, biases (1,out) f32."""
    pad_dims = [(D_IN_PAD, H1P), (H1P, H2P), (H2P, H3P), (H3P, D_OUT_PAD)]
    packed = []
    for (w, b), (pi, po) in zip(params_f32, pad_dims):
        fi, fo = w.shape
        w_pad = jnp.zeros((pi, po), jnp.float32).at[:fi, :fo].set(w)
        b_pad = jnp.zeros((1, po), jnp.float32).at[0, :fo].set(b)
        packed.append((w_pad.astype(jnp.bfloat16), b_pad))
    return packed


def reference_forward_matched(x, packed):
    """Pure-JAX reference with identical numerics (bf16 operands, f32 accumulate)."""
    B = x.shape[0]
    h = jnp.pad(x.reshape(B, D_IN), ((0, 0), (0, D_IN_PAD - D_IN)))
    for idx, (w, b) in enumerate(packed):
        h = jnp.dot(h.astype(jnp.bfloat16), w,
                    preferred_element_type=jnp.float32) + b
        if idx < 3:
            h = jnp.maximum(h, 0.0)
    return jnp.squeeze(h[:, :D_OUT].reshape(B, 40, 2))


def reference_forward_f32(x, params_f32):
    """True f32 network (PyTorch-equivalent numerics)."""
    B = x.shape[0]
    h = x.reshape(B, D_IN)
    for idx, (w, b) in enumerate(params_f32):
        h = h @ w + b
        if idx < 3:
            h = jnp.maximum(h, 0.0)
    return jnp.squeeze(h.reshape(B, 40, 2))


if __name__ == "__main__":
    key = jax.random.PRNGKey(0)
    key, kx1, kx2 = jax.random.split(key, 3)
    params_f32 = init_params(key)
    packed = pack_params(params_f32)

    # Small demo batch (matches the module's 40x2 coordinate layout).
    B = 4
    x = jax.random.normal(kx1, (B, 40, 2), dtype=jnp.float32)
    out = jax.block_until_ready(elastic_forward(x, packed))
    assert out.shape == (B, 40, 2), out.shape
    assert jnp.allclose(out, reference_forward_matched(x, packed),
                        atol=2e-3, rtol=2e-3), "mismatch vs bf16-matched ref (B=4)"
    assert jnp.allclose(out, reference_forward_f32(x, params_f32),
                        atol=2.5e-2, rtol=2.5e-2), "mismatch vs f32 ref (B=4)"

    # Larger batch exercising multiple grid steps, batch padding and the
    # two-chain (row-half) kernel path.
    B2 = 384
    x2 = jax.random.normal(kx2, (B2, 40, 2), dtype=jnp.float32)
    out2 = jax.block_until_ready(elastic_forward(x2, packed))
    assert out2.shape == (B2, 40, 2), out2.shape
    assert jnp.allclose(out2, reference_forward_matched(x2, packed),
                        atol=2e-3, rtol=2e-3), "mismatch vs bf16-matched ref (B=384)"
    assert jnp.allclose(out2, reference_forward_f32(x2, params_f32),
                        atol=2.5e-2, rtol=2.5e-2), "mismatch vs f32 ref (B=384)"

    print("KERNEL_OK")
</pallas_src>

<mosaic_0001>
module attributes {stable_mosaic.version = 11 : i64} {
  func.func @kernel(%arg0: i32, %arg1: memref<8x128xf32, #tpu.memory_space<vmem>>, %arg2: memref<128x384xbf16, #tpu.memory_space<vmem>>, %arg3: memref<1x384xf32, #tpu.memory_space<vmem>>, %arg4: memref<384x512xbf16, #tpu.memory_space<vmem>>, %arg5: memref<1x512xf32, #tpu.memory_space<vmem>>, %arg6: memref<512x384xbf16, #tpu.memory_space<vmem>>, %arg7: memref<1x384xf32, #tpu.memory_space<vmem>>, %arg8: memref<384x128xbf16, #tpu.memory_space<vmem>>, %arg9: memref<1x128xf32, #tpu.memory_space<vmem>>, %arg10: memref<8x128xf32, #tpu.memory_space<vmem>>) attributes {dimension_semantics = [#tpu.dimension_semantics<parallel>], iteration_bounds = array<i64: 1>, scalar_prefetch = 0 : i64, scratch_operands = 0 : i64, tpu.core_type = #tpu.core_type<tc>, window_params = [{transform_indices = @transform_0, window_bounds = array<i64: 8, 128>}, {pipeline_mode = #tpu.pipeline_mode<synchronous>, transform_indices = @transform_1, window_bounds = array<i64: 128, 384>}, {pipeline_mode = #tpu.pipeline_mode<synchronous>, transform_indices = @transform_2, window_bounds = array<i64: 1, 384>}, {pipeline_mode = #tpu.pipeline_mode<synchronous>, transform_indices = @transform_3, window_bounds = array<i64: 384, 512>}, {pipeline_mode = #tpu.pipeline_mode<synchronous>, transform_indices = @transform_4, window_bounds = array<i64: 1, 512>}, {pipeline_mode = #tpu.pipeline_mode<synchronous>, transform_indices = @transform_5, window_bounds = array<i64: 512, 384>}, {pipeline_mode = #tpu.pipeline_mode<synchronous>, transform_indices = @transform_6, window_bounds = array<i64: 1, 384>}, {pipeline_mode = #tpu.pipeline_mode<synchronous>, transform_indices = @transform_7, window_bounds = array<i64: 384, 128>}, {pipeline_mode = #tpu.pipeline_mode<synchronous>, transform_indices = @transform_8, window_bounds = array<i64: 1, 128>}, {transform_indices = @transform_9, window_bounds = array<i64: 8, 128>}]} {
    %c0 = arith.constant 0 : index
    %c0_0 = arith.constant 0 : index
    %0 = vector.load %arg2[%c0, %c0_0] : memref<128x384xbf16, #tpu.memory_space<vmem>>, vector<128x384xbf16>
    %c0_1 = arith.constant 0 : index
    %c0_2 = arith.constant 0 : index
    %1 = vector.load %arg3[%c0_1, %c0_2] : memref<1x384xf32, #tpu.memory_space<vmem>>, vector<1x384xf32>
    %c0_3 = arith.constant 0 : index
    %c0_4 = arith.constant 0 : index
    %2 = vector.load %arg4[%c0_3, %c0_4] : memref<384x512xbf16, #tpu.memory_space<vmem>>, vector<384x512xbf16>
    %c0_5 = arith.constant 0 : index
    %c0_6 = arith.constant 0 : index
    %3 = vector.load %arg5[%c0_5, %c0_6] : memref<1x512xf32, #tpu.memory_space<vmem>>, vector<1x512xf32>
    %c0_7 = arith.constant 0 : index
    %c0_8 = arith.constant 0 : index
    %4 = vector.load %arg6[%c0_7, %c0_8] : memref<512x384xbf16, #tpu.memory_space<vmem>>, vector<512x384xbf16>
    %c0_9 = arith.constant 0 : index
    %c0_10 = arith.constant 0 : index
    %5 = vector.load %arg7[%c0_9, %c0_10] : memref<1x384xf32, #tpu.memory_space<vmem>>, vector<1x384xf32>
    %c0_11 = arith.constant 0 : index
    %c0_12 = arith.constant 0 : index
    %6 = vector.load %arg8[%c0_11, %c0_12] : memref<384x128xbf16, #tpu.memory_space<vmem>>, vector<384x128xbf16>
    %c0_13 = arith.constant 0 : index
    %c0_14 = arith.constant 0 : index
    %7 = vector.load %arg9[%c0_13, %c0_14] : memref<1x128xf32, #tpu.memory_space<vmem>>, vector<1x128xf32>
    %c0_15 = arith.constant 0 : index
    %c0_16 = arith.constant 0 : index
    %8 = vector.load %arg1[%c0_15, %c0_16] : memref<8x128xf32, #tpu.memory_space<vmem>>, vector<8x128xf32>
    %9 = arith.truncf %8 : vector<8x128xf32> to vector<8x128xbf16>
    %cst = arith.constant dense<0.000000e+00> : vector<8x384xf32>
    %10 = tpu.matmul %9, %0, %cst {dimension_numbers = #tpu.dot_dimension_numbers<[1], [0], [0], [1], [0, 0, 1, 1], [], []>} : vector<8x128xbf16>, vector<128x384xbf16>, vector<8x384xf32> -> vector<8x384xf32>
    %11 = vector.broadcast %1 : vector<1x384xf32> to vector<8x384xf32>
    %12 = arith.addf %10, %11 : vector<8x384xf32>
    %cst_17 = arith.constant 0.000000e+00 : f32
    %13 = vector.broadcast %cst_17 : f32 to vector<8x384xf32>
    %14 = arith.maximumf %12, %13 : vector<8x384xf32>
    %15 = arith.truncf %14 : vector<8x384xf32> to vector<8x384xbf16>
    %cst_18 = arith.constant dense<0.000000e+00> : vector<8x512xf32>
    %16 = tpu.matmul %15, %2, %cst_18 {dimension_numbers = #tpu.dot_dimension_numbers<[1], [0], [0], [1], [0, 0, 1, 1], [], []>} : vector<8x384xbf16>, vector<384x512xbf16>, vector<8x512xf32> -> vector<8x512xf32>
    %17 = vector.broadcast %3 : vector<1x512xf32> to vector<8x512xf32>
    %18 = arith.addf %16, %17 : vector<8x512xf32>
    %cst_19 = arith.constant 0.000000e+00 : f32
    %19 = vector.broadcast %cst_19 : f32 to vector<8x512xf32>
    %20 = arith.maximumf %18, %19 : vector<8x512xf32>
    %21 = arith.truncf %20 : vector<8x512xf32> to vector<8x512xbf16>
    %cst_20 = arith.constant dense<0.000000e+00> : vector<8x384xf32>
    %22 = tpu.matmul %21, %4, %cst_20 {dimension_numbers = #tpu.dot_dimension_numbers<[1], [0], [0], [1], [0, 0, 1, 1], [], []>} : vector<8x512xbf16>, vector<512x384xbf16>, vector<8x384xf32> -> vector<8x384xf32>
    %23 = vector.broadcast %5 : vector<1x384xf32> to vector<8x384xf32>
    %24 = arith.addf %22, %23 : vector<8x384xf32>
    %cst_21 = arith.constant 0.000000e+00 : f32
    %25 = vector.broadcast %cst_21 : f32 to vector<8x384xf32>
    %26 = arith.maximumf %24, %25 : vector<8x384xf32>
    %27 = arith.truncf %26 : vector<8x384xf32> to vector<8x384xbf16>
    %cst_22 = arith.constant dense<0.000000e+00> : vector<8x128xf32>
    %28 = tpu.matmul %27, %6, %cst_22 {dimension_numbers = #tpu.dot_dimension_numbers<[1], [0], [0], [1], [0, 0, 1, 1], [], []>} : vector<8x384xbf16>, vector<384x128xbf16>, vector<8x128xf32> -> vector<8x128xf32>
    %29 = vector.broadcast %7 : vector<1x128xf32> to vector<8x128xf32>
    %30 = arith.addf %28, %29 : vector<8x128xf32>
    %c0_23 = arith.constant 0 : index
    %c0_24 = arith.constant 0 : index
    %31 = vector.load %arg10[%c0_23, %c0_24] : memref<8x128xf32, #tpu.memory_space<vmem>>, vector<8x128xf32>
    tpu.vector_store %arg10[%c0_23, %c0_24], %30 {strides = array<i32>} : memref<8x128xf32, #tpu.memory_space<vmem>>, vector<8x128xf32>,
    return
  }
  func.func @transform_0(%arg0: i32) -> (i32, i32) {
    %c0_i32 = arith.constant 0 : i32
    %c0_i32_0 = arith.constant 0 : i32
    return %arg0, %c0_i32 : i32, i32
  }
  func.func @transform_1(%arg0: i32) -> (i32, i32) {
    %c0_i32 = arith.constant 0 : i32
    %c0_i32_0 = arith.constant 0 : i32
    %c0_i32_1 = arith.constant 0 : i32
    return %c0_i32, %c0_i32_0 : i32, i32
  }
  func.func @transform_2(%arg0: i32) -> (i32, i32) {
    %c0_i32 = arith.constant 0 : i32
    %c0_i32_0 = arith.constant 0 : i32
    %c0_i32_1 = arith.constant 0 : i32
    return %c0_i32, %c0_i32_0 : i32, i32
  }
  func.func @transform_3(%arg0: i32) -> (i32, i32) {
    %c0_i32 = arith.constant 0 : i32
    %c0_i32_0 = arith.constant 0 : i32
    %c0_i32_1 = arith.constant 0 : i32
    return %c0_i32, %c0_i32_0 : i32, i32
  }
  func.func @transform_4(%arg0: i32) -> (i32, i32) {
    %c0_i32 = arith.constant 0 : i32
    %c0_i32_0 = arith.constant 0 : i32
    %c0_i32_1 = arith.constant 0 : i32
    return %c0_i32, %c0_i32_0 : i32, i32
  }
  func.func @transform_5(%arg0: i32) -> (i32, i32) {
    %c0_i32 = arith.constant 0 : i32
    %c0_i32_0 = arith.constant 0 : i32
    %c0_i32_1 = arith.constant 0 : i32
    return %c0_i32, %c0_i32_0 : i32, i32
  }
  func.func @transform_6(%arg0: i32) -> (i32, i32) {
    %c0_i32 = arith.constant 0 : i32
    %c0_i32_0 = arith.constant 0 : i32
    %c0_i32_1 = arith.constant 0 : i32
    return %c0_i32, %c0_i32_0 : i32, i32
  }
  func.func @transform_7(%arg0: i32) -> (i32, i32) {
    %c0_i32 = arith.constant 0 : i32
    %c0_i32_0 = arith.constant 0 : i32
    %c0_i32_1 = arith.constant 0 : i32
    return %c0_i32, %c0_i32_0 : i32, i32
  }
  func.func @transform_8(%arg0: i32) -> (i32, i32) {
    %c0_i32 = arith.constant 0 : i32
    %c0_i32_0 = arith.constant 0 : i32
    %c0_i32_1 = arith.constant 0 : i32
    return %c0_i32, %c0_i32_0 : i32, i32
  }
  func.func @transform_9(%arg0: i32) -> (i32, i32) {
    %c0_i32 = arith.constant 0 : i32
    %c0_i32_0 = arith.constant 0 : i32
    return %arg0, %c0_i32 : i32, i32
  }
}

</mosaic_0001>

<bundles_post_ra>
// kernel: tpu_custom_call.1
= control target key start
LH: loop header
LB: loop body
LE: loop exit
PB: predicated region body
PF: predicated region fallthrough
CT: control target
= control target key end

     0   :  { %14 = vsyncpa [#allocation3], 0  ;;  %s3331_s0 = inlined_call_operand.hbm [shape: f32[8,128], index: 0, kind: input, shape index: {}]   ;;  %s3332_s1 = inlined_call_operand.hbm [shape: bf16[128,384], index: 1, kind: input, shape index: {}]   ;;  %s3333_s2 = inlined_call_operand.vmem [shape: f32[1,384], index: 2, kind: input, shape index: {}]   ;;  %s3334_s3 = inlined_call_operand.hbm [shape: bf16[384,512], index: 3, kind: input, shape index: {}]   ;;  %s3335_s4 = inlined_call_operand.vmem [shape: f32[1,512], index: 4, kind: input, shape index: {}]   ;;  %s3336_s5 = inlined_call_operand.hbm [shape: bf16[512,384], index: 5, kind: input, shape index: {}]   ;;  %s3337_s6 = inlined_call_operand.vmem [shape: f32[1,384], index: 6, kind: input, shape index: {}]   ;;  %s3338_s7 = inlined_call_operand.hbm [shape: bf16[384,128], index: 7, kind: input, shape index: {}]   ;;  %s3339_s8 = inlined_call_operand.vmem [shape: f32[1,128], index: 8, kind: input, shape index: {}]   ;;  %s3340_s9 = inlined_call_operand.hbm [shape: f32[8,128], index: 9, kind: output, shape index: {}]  }
   0x1   :  { %15 = vsyncpa [#allocation6], 0 }
   0x2   :  { %16 = vsyncpa [#allocation9], 0 }
   0x3   :  { %17 = vsyncpa [#allocation4], 0  ;;  %s3124_s30 = smov [#allocation5]   ;;  %s2984_s13 = scalar_lea.hbm %s3332_s1, 3072 }
   0x4   :  { %s33_s10 = sshll.u32 %s3124_s30, 4  ;;  %p2985_p0 = scmp.ne.s32.totalorder %s3332_s1, %s2984_s13  ;;  %s34_s10 = int_to_ptr.vmem [resolvable:$true] %s33_s10 }
   0x5   :  { %p2988_p1 = scmp.lt.u32.totalorder %s2984_s13, %s3332_s1 }
   0x7   :  { %p2990_p2 = pnand %p2988_p1, %p2985_p0 }
   0x9   :  { %2993 = shalt.err (!%p2990_p2)
}
   0xa   :  { %s2994_s18 = scalar_lea.vmem %s34_s10, 3072  ;;  %p2999_p4 = scmp.lt.s32.totalorder %s34_s10, %s34_s10 }
   0xb   :  { %p2995_p3 = scmp.ne.s32.totalorder %s34_s10, %s2994_s18  ;;  %p3000_p5 = scmp.lt.s32.totalorder %s2994_s18, %s2994_s18 }
   0xd   :  { %p3001_p6 = por %p3000_p5, %p2999_p4 }
   0xf   :  { %p3002_p7 = pnand %p3001_p6, %p2995_p3 }
  0x11   :  { %3005 = shalt.err (!%p3002_p7)
}
  0x12   :  { %s3125_s19 = smov 192   ;;  %s3126_s20 = smov 12  }
  0x13   :  { %39 = dma.hbm_to_vmem [thread:$0]  %s3332_s1, 3072, %s34_s10, [#allocation6], %s3125_s19, %s3125_s19, %s3126_s20  }
  0x14   :  { %s3127_s23 = smov [#allocation8]   ;;  %s3128_s25 = smov [#allocation2]  }
  0x15   :  { %s61_s24 = sshll.u32 %s3127_s23, 4  ;;  %s24_s26 = sshll.u32 %s3128_s25, 4  ;;  %s62_s24 = int_to_ptr.vmem [resolvable:$true] %s61_s24  ;;  %s25_s26 = int_to_ptr.vmem [resolvable:$true] %s24_s26 }
  0x16   :  { %s3006_s29 = scalar_lea.hbm %s3336_s5, 12288 }
  0x17   :  { %p3007_p8 = scmp.ne.s32.totalorder %s3336_s5, %s3006_s29  ;;  %p3010_p9 = scmp.lt.u32.totalorder %s3006_s29, %s3336_s5 }
  0x19   :  { %p3012_p10 = pnand %p3010_p9, %p3007_p8 }
  0x1b   :  { %3015 = shalt.err (!%p3012_p10)
}
  0x1c   :  { %s3016_s1 = scalar_lea.vmem %s62_s24, 12288  ;;  %p3021_p12 = scmp.lt.s32.totalorder %s62_s24, %s62_s24 }
  0x1d   :  { %p3017_p11 = scmp.ne.s32.totalorder %s62_s24, %s3016_s1  ;;  %p3022_p13 = scmp.lt.s32.totalorder %s3016_s1, %s3016_s1 }
  0x1f   :  { %p3023_p0 = por %p3022_p13, %p3021_p12 }
  0x21   :  { %p3024_p1 = pnand %p3023_p0, %p3017_p11 }
  0x23   :  { %3027 = shalt.err (!%p3024_p1)
}
  0x24   :  { %67 = dma.hbm_to_vmem [thread:$0]  %s3336_s5, 12288, %s62_s24, [#allocation9], %s3125_s19, %s3125_s19, %s3126_s20  }
  0x25   :  { %s3028_s17 = scalar_lea.hbm %s3331_s0, 128 }
  0x26   :  { %p3029_p2 = scmp.ne.s32.totalorder %s3331_s0, %s3028_s17  ;;  %p3032_p3 = scmp.lt.u32.totalorder %s3028_s17, %s3331_s0 }
  0x28   :  { %p3034_p4 = pnand %p3032_p3, %p3029_p2 }
  0x2a   :  { %3037 = shalt.err (!%p3034_p4)
}
  0x2b   :  { %s3038_s25 = scalar_lea.vmem %s25_s26, 128  ;;  %p3043_p6 = scmp.lt.s32.totalorder %s25_s26, %s25_s26 }
  0x2c   :  { %p3039_p5 = scmp.ne.s32.totalorder %s25_s26, %s3038_s25  ;;  %p3044_p7 = scmp.lt.s32.totalorder %s3038_s25, %s3038_s25 }
  0x2e   :  { %p3045_p8 = por %p3044_p7, %p3043_p6 }
  0x30   :  { %p3046_p9 = pnand %p3045_p8, %p3039_p5 }
  0x32   :  { %3049 = shalt.err (!%p3046_p9)
}
  0x33   :  { %27 = dma.hbm_to_vmem [thread:$0]  %s3331_s0, 128, %s25_s26, [#allocation3]  }
  0x34   :  { %s3129_s20 = smov [#allocation7]   ;;  %s3050_s29 = scalar_lea.hbm %s3334_s3, 12288 }
  0x35   :  { %s47_s24 = sshll.u32 %s3129_s20, 4  ;;  %p3051_p10 = scmp.ne.s32.totalorder %s3334_s3, %s3050_s29  ;;  %s48_s24 = int_to_ptr.vmem [resolvable:$true] %s47_s24 }
  0x36   :  { %p3054_p11 = scmp.lt.u32.totalorder %s3050_s29, %s3334_s3 }
  0x38   :  { %p3056_p12 = pnand %p3054_p11, %p3051_p10 }
  0x3a   :  { %3059 = shalt.err (!%p3056_p12)
}
  0x3b   :  { %s3060_s1 = scalar_lea.vmem %s48_s24, 12288  ;;  %p3065_p0 = scmp.lt.s32.totalorder %s48_s24, %s48_s24 }
  0x3c   :  { %p3061_p13 = scmp.ne.s32.totalorder %s48_s24, %s3060_s1  ;;  %p3066_p1 = scmp.lt.s32.totalorder %s3060_s1, %s3060_s1 }
  0x3e   :  { %p3067_p2 = por %p3066_p1, %p3065_p0 }
  0x40   :  { %p3068_p3 = pnand %p3067_p2, %p3061_p13 }
  0x42   :  { %3071 = shalt.err (!%p3068_p3)
}
  0x43   :  { %s3130_s0 = smov 256   ;;  %s3131_s26 = smov 16  }
  0x44   :  { %53 = dma.hbm_to_vmem [thread:$0]  %s3334_s3, 12288, %s48_s24, [#allocation6], %s3130_s0, %s3130_s0, %s3131_s26  }
  0x45   :  { %s3132_s15 = smov [#allocation10]   ;;  %s3072_s21 = scalar_lea.hbm %s3338_s7, 3072 }
  0x46   :  { %s75_s16 = sshll.u32 %s3132_s15, 4  ;;  %p3073_p4 = scmp.ne.s32.totalorder %s3338_s7, %s3072_s21  ;;  %s76_s16 = int_to_ptr.vmem [resolvable:$true] %s75_s16 }
  0x47   :  { %p3076_p5 = scmp.lt.u32.totalorder %s3072_s21, %s3338_s7 }
  0x49   :  { %p3078_p6 = pnand %p3076_p5, %p3073_p4 }
  0x4b   :  { %3081 = shalt.err (!%p3078_p6)
}
  0x4c   :  { %s3082_s19 = scalar_lea.vmem %s76_s16, 3072  ;;  %p3087_p8 = scmp.lt.s32.totalorder %s76_s16, %s76_s16 }
  0x4d   :  { %p3083_p7 = scmp.ne.s32.totalorder %s76_s16, %s3082_s19  ;;  %p3088_p9 = scmp.lt.s32.totalorder %s3082_s19, %s3082_s19 }
  0x4f   :  { %p3089_p10 = por %p3088_p9, %p3087_p8 }
  0x51   :  { %p3090_p11 = pnand %p3089_p10, %p3083_p7 }
  0x53   :  { %3093 = shalt.err (!%p3090_p11)
}
  0x54   :  { %s3133_s3 = smov 64   ;;  %s3134_s20 = smov 4  }
  0x55   :  { %81 = dma.hbm_to_vmem [thread:$0]  %s3338_s7, 3072, %s76_s16, [#allocation9], %s3133_s3, %s3133_s3, %s3134_s20  }
  0x56   :  { %3116 = dma.done.wait [#allocation3], 128  }
  0x57   :  { %3117 = vsyncadd [#allocation3], 4294967168 }
  0x58   :  { %3118 = dma.done.wait [#allocation6], 15360  }
  0x59   :  { %3119 = vsyncadd [#allocation6], 4294951936 }
  0x5a   :  { %3120 = dma.done.wait [#allocation9], 15360  }
  0x5b   :  { %3121 = vsyncadd [#allocation9], 4294951936  ;;  %v3135_v0 = vmov 0.0   ;;  %v3136_v1 = vmov 0   ;;  %vm3137_vm0 = vmmov 0   ;;  %v408_v23 = vld [vmem:[#allocation2] sm:$0xff] }
  0x5c   :  { %2583 = vmatprep.subr.bf16.mxu1 %v3135_v0  ;;  %586 = vmatprep.mubr.bf16.mxu0 %v3136_v1  ;;  %v2656_v2 = vld [vmem:[#allocation5 + $0x4] ss:$12 sps:$4 sm:$0xff]   ;;  %v2658_v3 = vld [vmem:[#allocation5] ss:$12 sps:$4 sm:$0xff]   ;;  %v2659_v4 = vld [vmem:[#allocation5 + $0x1c] ss:$12 sps:$4 sm:$0xff]   ;;  %v409_v26 = vpack.c.bf16 %v408_v23, %v408_v23 }
  0x5d   :  { %2599 = vmatprep.mubr.msk.bf16.mxu1 %vm3137_vm0, %v3135_v0  ;;  %554 = vmatprep.subr.bf16.mxu0 %v2656_v2  ;;  %v2661_v5 = vld [vmem:[#allocation5 + $0x18] ss:$12 sps:$4 sm:$0xff]   ;;  %v2662_v6 = vld [vmem:[#allocation5 + $0x34] ss:$12 sps:$4 sm:$0xff]   ;;  %v2664_v7 = vld [vmem:[#allocation5 + $0x30] ss:$12 sps:$4 sm:$0xff]  }
  0x5e   :  { %555 = vmatpush1.bf16.msra.mxu0 %v2658_v3  ;;  %v2665_v8 = vld [vmem:[#allocation5 + $0x4c] ss:$12 sps:$4 sm:$0xff]   ;;  %v2667_v9 = vld [vmem:[#allocation5 + $0x48] ss:$12 sps:$4 sm:$0xff]   ;;  %v2668_v11 = vld [vmem:[#allocation5 + $0x64] ss:$12 sps:$4 sm:$0xff]  }
  0x5f   :  { %556 = vmatprep.subr.bf16.mxu0 %v2659_v4  ;;  %v2680_v10 = vld [vmem:[#allocation5 + $0x8] ss:$12 sps:$4 sm:$0xff]   ;;  %v2681_v12 = vld [vmem:[#allocation5 + $0x20] ss:$12 sps:$4 sm:$0xff]   ;;  %v2682_v15 = vld [vmem:[#allocation5 + $0x38] ss:$12 sps:$4 sm:$0xff]  }
  0x60   :  { %2584 = vmatpush3.bf16.msra.mxu1 %v2680_v10  ;;  %v2670_v13 = vld [vmem:[#allocation5 + $0x60] ss:$12 sps:$4 sm:$0xff]   ;;  %v2671_v14 = vld [vmem:[#allocation5 + $0x7c] ss:$12 sps:$4 sm:$0xff]   ;;  %v2673_v16 = vld [vmem:[#allocation5 + $0x78] ss:$12 sps:$4 sm:$0xff]  }
  0x61   :  { %2585 = vmatprep.subr.bf16.mxu1 %v3135_v0  ;;  %v2674_v17 = vld [vmem:[#allocation5 + $0x94] ss:$12 sps:$4 sm:$0xff]   ;;  %v2683_v18 = vld [vmem:[#allocation5 + $0x50] ss:$12 sps:$4 sm:$0xff]   ;;  %v2677_v20 = vld [vmem:[#allocation5 + $0xac] ss:$12 sps:$4 sm:$0xff]  }
  0x62   :  { %557 = vmatpush1.bf16.msra.mxu0 %v2661_v5  ;;  %v2676_v19 = vld [vmem:[#allocation5 + $0x90] ss:$12 sps:$4 sm:$0xff]   ;;  %v2684_v21 = vld [vmem:[#allocation5 + $0x68] ss:$12 sps:$4 sm:$0xff]   ;;  %v2685_v25 = vld [vmem:[#allocation5 + $0x80] ss:$12 sps:$4 sm:$0xff]  }
  0x63   :  { %558 = vmatprep.subr.bf16.mxu0 %v2662_v6  ;;  %v2679_v22 = vld [vmem:[#allocation5 + $0xa8] ss:$12 sps:$4 sm:$0xff]   ;;  %v2688_v27 = vld [vmem:[#allocation7] ss:$16 sps:$4 sm:$0xff]   ;;  %v2686_v29 = vld [vmem:[#allocation5 + $0x98] ss:$12 sps:$4 sm:$0xff]  }
  0x64   :  { %2586 = vmatpush3.bf16.msra.mxu1 %v2681_v12  ;;  %v2690_v24 = vld [vmem:[#allocation7 + $0x4] ss:$16 sps:$4 sm:$0xff]   ;;  %v2694_v30 = vld [vmem:[#allocation7 + $0x20] ss:$16 sps:$4 sm:$0xff]   ;;  %v2693_v33 = vld [vmem:[#allocation7 + $0xc] ss:$16 sps:$4 sm:$0xff]  }
  0x65   :  { %2587 = vmatprep.subr.bf16.mxu1 %v3135_v0  ;;  %v2696_v28 = vld [vmem:[#allocation7 + $0x24] ss:$16 sps:$4 sm:$0xff]   ;;  %v2687_v32 = vld [vmem:[#allocation5 + $0xb0] ss:$12 sps:$4 sm:$0xff]   ;;  %v2691_v36 = vld [vmem:[#allocation7 + $0x8] ss:$16 sps:$4 sm:$0xff]  }
  0x66   :  { %559 = vmatpush1.bf16.msra.mxu0 %v2664_v7  ;;  %v2702_v31 = vld [vmem:[#allocation7 + $0x44] ss:$16 sps:$4 sm:$0xff]   ;;  %v2700_v34 = vld [vmem:[#allocation7 + $0x40] ss:$16 sps:$4 sm:$0xff]   ;;  %v2699_v37 = vld [vmem:[#allocation7 + $0x2c] ss:$16 sps:$4 sm:$0xff]  }
  0x67   :  { %560 = vmatprep.subr.bf16.mxu0 %v2665_v8  ;;  %v2708_v35 = vld [vmem:[#allocation7 + $0x64] ss:$16 sps:$4 sm:$0xff]   ;;  %v2706_v38 = vld [vmem:[#allocation7 + $0x60] ss:$16 sps:$4 sm:$0xff]   ;;  %v2697_v40 = vld [vmem:[#allocation7 + $0x28] ss:$16 sps:$4 sm:$0xff]  }
  0x68   :  { %2588 = vmatpush3.bf16.msra.mxu1 %v2682_v15  ;;  %v2714_v39 = vld [vmem:[#allocation7 + $0x84] ss:$16 sps:$4 sm:$0xff]   ;;  %v2705_v41 = vld [vmem:[#allocation7 + $0x4c] ss:$16 sps:$4 sm:$0xff]   ;;  %v2712_v42 = vld [vmem:[#allocation7 + $0x80] ss:$16 sps:$4 sm:$0xff]  }
  0x69   :  { %2589 = vmatprep.subr.bf16.mxu1 %v3135_v0  ;;  %v2720_v43 = vld [vmem:[#allocation7 + $0xa4] ss:$16 sps:$4 sm:$0xff]   ;;  %v2703_v44 = vld [vmem:[#allocation7 + $0x48] ss:$16 sps:$4 sm:$0xff]   ;;  %v2711_v45 = vld [vmem:[#allocation7 + $0x6c] ss:$16 sps:$4 sm:$0xff]  }
  0x6a   :  { %561 = vmatpush1.bf16.msra.mxu0 %v2667_v9  ;;  %v2718_v46 = vld [vmem:[#allocation7 + $0xa0] ss:$16 sps:$4 sm:$0xff]   ;;  %v2726_v47 = vld [vmem:[#allocation7 + $0xc4] ss:$16 sps:$4 sm:$0xff]   ;;  %v2709_v48 = vld [vmem:[#allocation7 + $0x68] ss:$16 sps:$4 sm:$0xff]  }
  0x6b   :  { %562 = vmatprep.subr.bf16.mxu0 %v2668_v11  ;;  %v2717_v49 = vld [vmem:[#allocation7 + $0x8c] ss:$16 sps:$4 sm:$0xff]   ;;  %v2715_v50 = vld [vmem:[#allocation7 + $0x88] ss:$16 sps:$4 sm:$0xff]   ;;  %v2724_v51 = vld [vmem:[#allocation7 + $0xc0] ss:$16 sps:$4 sm:$0xff]  }
  0x6c   :  { %2590 = vmatpush3.bf16.msra.mxu1 %v2683_v18  ;;  %v2723_v52 = vld [vmem:[#allocation7 + $0xac] ss:$16 sps:$4 sm:$0xff]   ;;  %v2732_v53 = vld [vmem:[#allocation7 + $0xe4] ss:$16 sps:$4 sm:$0xff]   ;;  %v2730_v54 = vld [vmem:[#allocation7 + $0xe0] ss:$16 sps:$4 sm:$0xff]  }
  0x6d   :  { %2591 = vmatprep.subr.bf16.mxu1 %v3135_v0  ;;  %v2738_v55 = vld [vmem:[#allocation7 + $0x104] ss:$16 sps:$4 sm:$0xff]   ;;  %v2721_v56 = vld [vmem:[#allocation7 + $0xa8] ss:$16 sps:$4 sm:$0xff]   ;;  %v2729_v57 = vld [vmem:[#allocation7 + $0xcc] ss:$16 sps:$4 sm:$0xff]  }
  0x6e   :  { %563 = vmatpush1.bf16.msra.mxu0 %v2670_v13  ;;  %v2736_v58 = vld [vmem:[#allocation7 + $0x100] ss:$16 sps:$4 sm:$0xff]   ;;  %v2744_v59 = vld [vmem:[#allocation7 + $0x124] ss:$16 sps:$4 sm:$0xff]   ;;  %v2727_v60 = vld [vmem:[#allocation7 + $0xc8] ss:$16 sps:$4 sm:$0xff]  }
  0x6f   :  { %564 = vmatprep.subr.bf16.mxu0 %v2671_v14  ;;  %v2735_v61 = vld [vmem:[#allocation7 + $0xec] ss:$16 sps:$4 sm:$0xff]   ;;  %v2742_v62 = vld [vmem:[#allocation7 + $0x120] ss:$16 sps:$4 sm:$0xff]   ;;  %v2750_v63 = vld [vmem:[#allocation7 + $0x144] ss:$16 sps:$4 sm:$0xff]  }
  0x70   :  { %2592 = vmatpush3.bf16.msra.mxu1 %v2684_v21  ;;  %v2733_v2 = vld [vmem:[#allocation7 + $0xe8] ss:$16 sps:$4 sm:$0xff]   ;;  %v2741_v3 = vld [vmem:[#allocation7 + $0x10c] ss:$16 sps:$4 sm:$0xff]   ;;  %v2748_v4 = vld [vmem:[#allocation7 + $0x140] ss:$16 sps:$4 sm:$0xff]  }
  0x71   :  { %2593 = vmatprep.subr.bf16.mxu1 %v3135_v0  ;;  %v2756_v5 = vld [vmem:[#allocation7 + $0x164] ss:$16 sps:$4 sm:$0xff]   ;;  %v2739_v6 = vld [vmem:[#allocation7 + $0x108] ss:$16 sps:$4 sm:$0xff]   ;;  %v2747_v7 = vld [vmem:[#allocation7 + $0x12c] ss:$16 sps:$4 sm:$0xff]  }
  0x72   :  { %565 = vmatpush1.bf16.msra.mxu0 %v2673_v16  ;;  %v2754_v8 = vld [vmem:[#allocation7 + $0x160] ss:$16 sps:$4 sm:$0xff]   ;;  %v2762_v9 = vld [vmem:[#allocation7 + $0x184] ss:$16 sps:$4 sm:$0xff]   ;;  %v2745_v10 = vld [vmem:[#allocation7 + $0x128] ss:$16 sps:$4 sm:$0xff]  }
  0x73   :  { %566 = vmatprep.subr.bf16.mxu0 %v2674_v17  ;;  %v2753_v11 = vld [vmem:[#allocation7 + $0x14c] ss:$16 sps:$4 sm:$0xff]   ;;  %v2760_v12 = vld [vmem:[#allocation7 + $0x180] ss:$16 sps:$4 sm:$0xff]   ;;  %v2768_v13 = vld [vmem:[#allocation7 + $0x1a4] ss:$16 sps:$4 sm:$0xff]  }
  0x74   :  { %2594 = vmatpush3.bf16.msra.mxu1 %v2685_v25  ;;  %v2751_v14 = vld [vmem:[#allocation7 + $0x148] ss:$16 sps:$4 sm:$0xff]   ;;  %v2759_v15 = vld [vmem:[#allocation7 + $0x16c] ss:$16 sps:$4 sm:$0xff]   ;;  %v2766_v16 = vld [vmem:[#allocation7 + $0x1a0] ss:$16 sps:$4 sm:$0xff]  }
  0x75   :  { %2595 = vmatprep.subr.bf16.mxu1 %v3135_v0  ;;  %v2757_v17 = vld [vmem:[#allocation7 + $0x168] ss:$16 sps:$4 sm:$0xff]   ;;  %v2765_v18 = vld [vmem:[#allocation7 + $0x18c] ss:$16 sps:$4 sm:$0xff]   ;;  %s3138_s12 = smov [#allocation11]  }
  0x76   :  { %567 = vmatpush1.bf16.msra.mxu0 %v2676_v19  ;;  %v2763_v19 = vld [vmem:[#allocation7 + $0x188] ss:$16 sps:$4 sm:$0xff]   ;;  %v2777_v23 = vld [vmem:[#allocation7 + $0x1cc] ss:$16 sps:$4 sm:$0xff]   ;;  %s2247_s13 = sshll.u32 %s3138_s12, 4  ;;  %s2248_s13 = int_to_ptr.vmem [resolvable:$true] %s2247_s13 }
  0x77   :  { %568 = vmatprep.subr.bf16.mxu0 %v2677_v20  ;;  %v2771_v20 = vld [vmem:[#allocation7 + $0x1ac] ss:$16 sps:$4 sm:$0xff]   ;;  %v2769_v21 = vld [vmem:[#allocation7 + $0x1a8] ss:$16 sps:$4 sm:$0xff]   ;;  %s3094_s1 = scalar_lea.vmem %s2248_s13, 128  ;;  %p3099_p13 = scmp.lt.s32.totalorder %s2248_s13, %s2248_s13 }
  0x78   :  { %2596 = vmatpush3.bf16.msra.mxu1 %v2686_v29  ;;  %v2775_v25 = vld [vmem:[#allocation7 + $0x1c8] ss:$16 sps:$4 sm:$0xff]   ;;  %p3095_p12 = scmp.ne.s32.totalorder %s2248_s13, %s3094_s1  ;;  %p3100_p0 = scmp.lt.s32.totalorder %s3094_s1, %s3094_s1 }
  0x79   :  { %2597 = vmatprep.subr.bf16.mxu1 %v3135_v0  ;;  %v2781_v29 = vld [vmem:[#allocation7 + $0x1e8] ss:$16 sps:$4 sm:$0xff]  }
  0x7a   :  { %569 = vmatpush1.bf16.msra.mxu0 %v2679_v22  ;;  %v2774_v22 = vld [vmem:[#allocation7 + $0x1c4] ss:$16 sps:$4 sm:$0xff]   ;;  %p3101_p1 = por %p3100_p0, %p3099_p13 }
  0x7b   :  { %1142 = vmatprep.subr.bf16.mxu0 %v2690_v24  ;;  %v2772_v24 = vld [vmem:[#allocation7 + $0x1c0] ss:$16 sps:$4 sm:$0xff]  }
  0x7c   :  { %2598 = vmatpush3.bf16.msra.mxu1 %v2687_v32  ;;  %v411_v32 = vlaneseq  ;;  %p3102_p2 = pnand %p3101_p1, %p3095_p12 }
  0x7d   :  { %587 = vmatmul.mubr.bf16.vlgmr.msra.gmra.mrb[0].mxu0 %v409_v26  ;;  %1224 = vmatprep.subr.bf16.mxu1 %v2693_v33 }
  0x7e   :  { %1143 = vmatpush1.bf16.msra.mxu0 %v2688_v27  ;;  %v2783_v27 = vld [vmem:[#allocation7 + $0x1ec] ss:$16 sps:$4 sm:$0xff]   ;;  %v3260_v33 = vshrl.u32 %v411_v32, 7 }
  0x7f   :  { %1144 = vmatprep.subr.bf16.mxu0 %v2696_v28  ;;  %2600 = vmatmul.mubr.bf16.vlgmr.msra.gmra.mrb[0].mxu1 %v409_v26  ;;  %v2780_v26 = vld [vmem:[#allocation7 + $0x1e4] ss:$16 sps:$4 sm:$0xff]   ;;  %v2778_v28 = vld [vmem:[#allocation7 + $0x1e0] ss:$16 sps:$4 sm:$0xff]  }
  0x80   :  { %1225 = vmatpush1.bf16.msra.mxu1 %v2691_v36  ;;  %v3271_v36 = vsub.s32 1, %v3260_v33  ;;  %v2865_v32 = vld [vmem:[#allocation8 + $0x20] ss:$12 sps:$4 sm:$0xff]  }
  0x81   :  { %1226 = vmatprep.subr.bf16.mxu1 %v2699_v37 }
  0x82   :  { %1145 = vmatpush1.bf16.msra.mxu0 %v2694_v30  ;;  %v2786_v30 = vld [vmem:[#allocation7 + $0x204] ss:$16 sps:$4 sm:$0xff]  }
  0x83   :  { %1146 = vmatprep.subr.bf16.mxu0 %v2702_v31  ;;  %v2789_v31 = vld [vmem:[#allocation7 + $0x20c] ss:$16 sps:$4 sm:$0xff]  }
  0x84   :  { %1227 = vmatpush1.bf16.msra.mxu1 %v2697_v40 }
  0x85   :  { %1228 = vmatprep.subr.bf16.mxu1 %v2705_v41 }
  0x86   :  { %1147 = vmatpush1.bf16.msra.mxu0 %v2700_v34  ;;  %v3263_v34 = vsub.s32 0, %v3260_v33 }
  0x87   :  { %1148 = vmatprep.subr.bf16.mxu0 %v2708_v35  ;;  %v3268_v35 = vld [vmem:[%s3333_s2] sm:$0x7] }
  0x88   :  { %1229 = vmatpush1.bf16.msra.mxu1 %v2703_v44  ;;  %v414_v37 = vrot.slane %v3268_v35, %v3263_v34 }
  0x89   :  { %1230 = vmatprep.subr.bf16.mxu1 %v2711_v45 }
  0x8a   :  { %1149 = vmatpush1.bf16.msra.mxu0 %v2706_v38  ;;  %v418_v38 = vrot.slane %v3268_v35, %v3271_v36 }
  0x8b   :  { %1150 = vmatprep.subr.bf16.mxu0 %v2714_v39 }
  0x8c   :  { %1231 = vmatpush1.bf16.msra.mxu1 %v2709_v48  ;;  %v2784_v48 = vld [vmem:[#allocation7 + $0x200] ss:$16 sps:$4 sm:$0xff]  }
  0x8d   :  { %1232 = vmatprep.subr.bf16.mxu1 %v2717_v49  ;;  %v2787_v49 = vld [vmem:[#allocation7 + $0x208] ss:$16 sps:$4 sm:$0xff]  }
  0x8e   :  { %1151 = vmatpush1.bf16.msra.mxu0 %v2712_v42 }
  0x8f   :  { %1152 = vmatprep.subr.bf16.mxu0 %v2720_v43 }
  0x90   :  { %1233 = vmatpush1.bf16.msra.mxu1 %v2715_v50 }
  0x91   :  { %1234 = vmatprep.subr.bf16.mxu1 %v2723_v52  ;;  %v2795_v52 = vld [vmem:[#allocation7 + $0x22c] ss:$16 sps:$4 sm:$0xff]  }
  0x92   :  { %1153 = vmatpush1.bf16.msra.mxu0 %v2718_v46 }
  0x93   :  { %1154 = vmatprep.subr.bf16.mxu0 %v2726_v47 }
  0x94   :  { %1235 = vmatpush1.bf16.msra.mxu1 %v2721_v56  ;;  %v2798_v56 = vld [vmem:[#allocation7 + $0x244] ss:$16 sps:$4 sm:$0xff]  }
  0x95   :  { %1236 = vmatprep.subr.bf16.mxu1 %v2729_v57  ;;  %v2801_v57 = vld [vmem:[#allocation7 + $0x24c] ss:$16 sps:$4 sm:$0xff]  }
  0x96   :  { %1155 = vmatpush1.bf16.msra.mxu0 %v2724_v51  ;;  %v2792_v51 = vld [vmem:[#allocation7 + $0x224] ss:$16 sps:$4 sm:$0xff]  }
  0x97   :  { %1156 = vmatprep.subr.bf16.mxu0 %v2732_v53  ;;  %v2790_v53 = vld [vmem:[#allocation7 + $0x220] ss:$16 sps:$4 sm:$0xff]  }
  0x98   :  { %1237 = vmatpush1.bf16.msra.mxu1 %v2727_v60 }
  0x99   :  { %1238 = vmatprep.subr.bf16.mxu1 %v2735_v61  ;;  %v2796_v61 = vld [vmem:[#allocation7 + $0x240] ss:$16 sps:$4 sm:$0xff]  }
  0x9a   :  { %1157 = vmatpush1.bf16.msra.mxu0 %v2730_v54  ;;  %v2793_v54 = vld [vmem:[#allocation7 + $0x228] ss:$16 sps:$4 sm:$0xff]  }
  0x9b   :  { %1158 = vmatprep.subr.bf16.mxu0 %v2738_v55 }
  0x9c   :  { %1239 = vmatpush1.bf16.msra.mxu1 %v2733_v2  ;;  %v2807_v2 = vld [vmem:[#allocation7 + $0x26c] ss:$16 sps:$4 sm:$0xff]  }
  0x9d   :  { %1240 = vmatprep.subr.bf16.mxu1 %v2741_v3  ;;  %v2802_v3 = vld [vmem:[#allocation7 + $0x260] ss:$16 sps:$4 sm:$0xff]  }
  0x9e   :  { %1159 = vmatpush1.bf16.msra.mxu0 %v2736_v58 }
  0x9f   :  { %1160 = vmatprep.subr.bf16.mxu0 %v2744_v59 }
  0xa0   :  { %1241 = vmatpush1.bf16.msra.mxu1 %v2739_v6  ;;  %v2813_v6 = vld [vmem:[#allocation7 + $0x28c] ss:$16 sps:$4 sm:$0xff]  }
  0xa1   :  { %1242 = vmatprep.subr.bf16.mxu1 %v2747_v7  ;;  %v3280_v7 = vsub.s32 2, %v3260_v33 }
  0xa2   :  { %1161 = vmatpush1.bf16.msra.mxu0 %v2742_v62  ;;  %v2799_v62 = vld [vmem:[#allocation7 + $0x248] ss:$16 sps:$4 sm:$0xff]  }
  0xa3   :  { %1162 = vmatprep.subr.bf16.mxu0 %v2750_v63  ;;  %v2804_v63 = vld [vmem:[#allocation7 + $0x264] ss:$16 sps:$4 sm:$0xff]  }
  0xa4   :  { %1243 = vmatpush1.bf16.msra.mxu1 %v2745_v10  ;;  %v2819_v10 = vld [vmem:[#allocation7 + $0x2ac] ss:$16 sps:$4 sm:$0xff]  }
  0xa5   :  { %1244 = vmatprep.subr.bf16.mxu1 %v2753_v11  ;;  %v422_v11 = vrot.slane %v3268_v35, %v3280_v7  ;;  %v2840_v35 = vld [vmem:[#allocation8 + $0x34] ss:$12 sps:$4 sm:$0xff]  }
  0xa6   :  { %1163 = vmatpush1.bf16.msra.mxu0 %v2748_v4  ;;  %v2805_v4 = vld [vmem:[#allocation7 + $0x268] ss:$16 sps:$4 sm:$0xff]  }
  0xa7   :  { %1164 = vmatprep.subr.bf16.mxu0 %v2756_v5  ;;  %v2810_v5 = vld [vmem:[#allocation7 + $0x284] ss:$16 sps:$4 sm:$0xff]  }
  0xa8   :  { %1245 = vmatpush1.bf16.msra.mxu1 %v2751_v14  ;;  %v2822_v14 = vld [vmem:[#allocation7 + $0x2c4] ss:$16 sps:$4 sm:$0xff]  }
  0xa9   :  { %1246 = vmatprep.subr.bf16.mxu1 %v2759_v15  ;;  %v2825_v15 = vld [vmem:[#allocation7 + $0x2cc] ss:$16 sps:$4 sm:$0xff]  }
  0xaa   :  { %1165 = vmatpush1.bf16.msra.mxu0 %v2754_v8  ;;  %v2811_v8 = vld [vmem:[#allocation7 + $0x288] ss:$16 sps:$4 sm:$0xff]  }
  0xab   :  { %1166 = vmatprep.subr.bf16.mxu0 %v2762_v9  ;;  %v2816_v9 = vld [vmem:[#allocation7 + $0x2a4] ss:$16 sps:$4 sm:$0xff]  }
  0xac   :  { %1247 = vmatpush1.bf16.msra.mxu1 %v2757_v17  ;;  %v2820_v17 = vld [vmem:[#allocation7 + $0x2c0] ss:$16 sps:$4 sm:$0xff]  }
  0xad   :  { %1248 = vmatprep.subr.bf16.mxu1 %v2765_v18  ;;  %v2823_v18 = vld [vmem:[#allocation7 + $0x2c8] ss:$16 sps:$4 sm:$0xff]  }
  0xae   :  { %1167 = vmatpush1.bf16.msra.mxu0 %v2760_v12  ;;  %v2814_v12 = vld [vmem:[#allocation7 + $0x2a0] ss:$16 sps:$4 sm:$0xff]  }
  0xaf   :  { %1168 = vmatprep.subr.bf16.mxu0 %v2768_v13  ;;  %v2817_v13 = vld [vmem:[#allocation7 + $0x2a8] ss:$16 sps:$4 sm:$0xff]  }
  0xb0   :  { %1249 = vmatpush1.bf16.msra.mxu1 %v2763_v19  ;;  %v2828_v19 = vld [vmem:[#allocation7 + $0x2e4] ss:$16 sps:$4 sm:$0xff]  }
  0xb1   :  { %1250 = vmatprep.subr.bf16.mxu1 %v2771_v20  ;;  %v2831_v20 = vld [vmem:[#allocation7 + $0x2ec] ss:$16 sps:$4 sm:$0xff]  }
  0xb2   :  { %1169 = vmatpush1.bf16.msra.mxu0 %v2766_v16 }
  0xb3   :  { %1170 = vmatprep.subr.bf16.mxu0 %v2774_v22  ;;  %v2826_v22 = vld [vmem:[#allocation7 + $0x2e0] ss:$16 sps:$4 sm:$0xff]  }
  0xb4   :  { %1251 = vmatpush1.bf16.msra.mxu1 %v2769_v21 }
  0xb5   :  { %1252 = vmatprep.subr.bf16.mxu1 %v2777_v23  ;;  %v2829_v23 = vld [vmem:[#allocation7 + $0x2e8] ss:$16 sps:$4 sm:$0xff]  }
  0xb6   :  { %1171 = vmatpush1.bf16.msra.mxu0 %v2772_v24  ;;  %v2834_v24 = vld [vmem:[#allocation8 + $0x4] ss:$12 sps:$4 sm:$0xff]  }
  0xb7   :  { %1172 = vmatprep.subr.bf16.mxu0 %v2780_v26 }
  0xb8   :  { %1253 = vmatpush1.bf16.msra.mxu1 %v2775_v25  ;;  %v2859_v25 = vld [vmem:[#allocation8 + $0xc8] ss:$12 sps:$4 sm:$0xff]  }
  0xb9   :  { %1254 = vmatprep.subr.bf16.mxu1 %v2783_v27  ;;  %v2832_v27 = vld [vmem:[#allocation8] ss:$12 sps:$4 sm:$0xff]  }
  0xba   :  { %1173 = vmatpush1.bf16.msra.mxu0 %v2778_v28  ;;  %v2860_v28 = vld [vmem:[#allocation8 + $0x8] ss:$12 sps:$4 sm:$0xff]  }
  0xbb   :  { %1183 = vmatprep.subr.bf16.mxu0 %v2786_v30  ;;  %v2864_v30 = vld [vmem:[#allocation8 + $0xe0] ss:$12 sps:$4 sm:$0xff]  }
  0xbc   :  { %1255 = vmatpush1.bf16.msra.mxu1 %v2781_v29  ;;  %v2837_v29 = vld [vmem:[#allocation8 + $0x1c] ss:$12 sps:$4 sm:$0xff]  }
  0xbd   :  { %1265 = vmatprep.subr.bf16.mxu1 %v2789_v31  ;;  %v2835_v31 = vld [vmem:[#allocation8 + $0x18] ss:$12 sps:$4 sm:$0xff]  }
 0x150   :  { %v588_v39 = vpop.f32.mrb[0].mxu0 }
 0x151   :  { %v589_v40 = vadd.f32 %v588_v39, %v414_v37  ;;  %v590_v41 = vpop.f32.mrb[1].mxu0  ;;  %v2869_v37 = vld [vmem:[#allocation8 + $0xf8] ss:$12 sps:$4 sm:$0xff]  }
 0x152   :  { %v591_v42 = vadd.f32 %v590_v41, %v418_v38  ;;  %v592_v43 = vpop.f32.mrb[2].mxu0  ;;  %v629_v55 = vpop.f32.mrb[0].mxu1  ;;  %v2838_v38 = vld [vmem:[#allocation8 + $0x30] ss:$12 sps:$4 sm:$0xff]   ;;  %v2870_v39 = vld [vmem:[#allocation8 + $0x38] ss:$12 sps:$4 sm:$0xff]  }
 0x153   :  { %v635_v44 = vmax.f32 %v589_v40, 0.0  ;;  %v593_v45 = vpop.f32.mrb[3].mxu0  ;;  %v2601_v58 = vpop.f32.mrb[1].mxu1  ;;  %v630_v16 = vadd.f32 %v629_v55, %v422_v11  ;;  %v2843_v40 = vld [vmem:[#allocation8 + $0x4c] ss:$12 sps:$4 sm:$0xff]  }
 0x154   :  { %v636_v46 = vmax.f32 %v591_v42, 0.0  ;;  %v632_v59 = vpop.f32.mrb[2].mxu1  ;;  %v2874_v41 = vld [vmem:[#allocation8 + $0x110] ss:$12 sps:$4 sm:$0xff]   ;;  %v2841_v42 = vld [vmem:[#allocation8 + $0x48] ss:$12 sps:$4 sm:$0xff]  }
 0x155   :  { %v638_v50 = vpack.c.bf16 %v635_v44, %v635_v44  ;;  %v2602_v60 = vpop.f32.mrb[3].mxu1  ;;  %v637_v21 = vmax.f32 %v630_v16, 0.0  ;;  %v2875_v43 = vld [vmem:[#allocation8 + $0x50] ss:$12 sps:$4 sm:$0xff]   ;;  %v2879_v45 = vld [vmem:[#allocation8 + $0x128] ss:$12 sps:$4 sm:$0xff]  }
 0x156   :  { %v639_v47 = vpack.c.bf16 %v636_v46, %v636_v46  ;;  %v2846_v44 = vld [vmem:[#allocation8 + $0x64] ss:$12 sps:$4 sm:$0xff]   ;;  %v2844_v46 = vld [vmem:[#allocation8 + $0x60] ss:$12 sps:$4 sm:$0xff]   ;;  %v2853_v55 = vld [vmem:[#allocation8 + $0xa8] ss:$12 sps:$4 sm:$0xff]  }
 0x157   :  { %v640_v26 = vpack.c.bf16 %v637_v21, %v637_v21  ;;  %v2863_v58 = vld [vmem:[#allocation8 + $0xdc] ss:$12 sps:$4 sm:$0xff]   ;;  %v2861_v59 = vld [vmem:[#allocation8 + $0xd8] ss:$12 sps:$4 sm:$0xff]   ;;  %v2868_v60 = vld [vmem:[#allocation8 + $0xf4] ss:$12 sps:$4 sm:$0xff]  }
 0x158   :  { %1174 = vmatprep.mubr.bf16.mxu0 %v639_v47  ;;  %1256 = vmatprep.mubr.bf16.mxu1 %v639_v47  ;;  %v2880_v47 = vld [vmem:[#allocation8 + $0x68] ss:$12 sps:$4 sm:$0xff]   ;;  %v2894_v11 = vld [vmem:[#allocation8 + $0x170] ss:$12 sps:$4 sm:$0xff]   ;;  %v3287_v16 = vld [vmem:[%s3335_s4] sm:$0xf] }
 0x159   :  { %1175 = vmatmul.mubr.bf16.vlgmr.msra.gmra.mrb[4].mxu0 %v638_v50  ;;  %1257 = vmatmul.mubr.bf16.vlgmr.msra.gmra.mrb[4].mxu1 %v638_v50  ;;  %v2847_v50 = vld [vmem:[#allocation8 + $0x78] ss:$12 sps:$4 sm:$0xff]  }
 0x15a   :  { %1184 = vmatpush1.bf16.msra.mxu0 %v2784_v48  ;;  %1266 = vmatpush1.bf16.msra.mxu1 %v2787_v49  ;;  %v2849_v48 = vld [vmem:[#allocation8 + $0x7c] ss:$12 sps:$4 sm:$0xff]   ;;  %v2884_v49 = vld [vmem:[#allocation8 + $0x140] ss:$12 sps:$4 sm:$0xff]  }
 0x15b   :  { %1185 = vmatprep.subr.bf16.mxu0 %v2792_v51  ;;  %1267 = vmatprep.subr.bf16.mxu1 %v2795_v52  ;;  %v2885_v51 = vld [vmem:[#allocation8 + $0x80] ss:$12 sps:$4 sm:$0xff]  }
 0x15c   :  { %1215 = vmatprep.mubr.bf16.mxu0 %v3136_v1  ;;  %1297 = vmatprep.mubr.bf16.mxu1 %v3136_v1  ;;  %v2808_v1 = vld [vmem:[#allocation7 + $0x280] ss:$16 sps:$4 sm:$0xff]  }
 0x15d   :  { %v2852_v52 = vld [vmem:[#allocation8 + $0x94] ss:$12 sps:$4 sm:$0xff]  }
 0x15e   :  { %1186 = vmatpush1.bf16.msra.mxu0 %v2790_v53  ;;  %1268 = vmatpush1.bf16.msra.mxu1 %v2793_v54  ;;  %v2850_v53 = vld [vmem:[#allocation8 + $0x90] ss:$12 sps:$4 sm:$0xff]   ;;  %v2855_v54 = vld [vmem:[#allocation8 + $0xac] ss:$12 sps:$4 sm:$0xff]  }
 0x15f   :  { %1187 = vmatprep.subr.bf16.mxu0 %v2798_v56  ;;  %1269 = vmatprep.subr.bf16.mxu1 %v2801_v57  ;;  %v2858_v56 = vld [vmem:[#allocation8 + $0xc4] ss:$12 sps:$4 sm:$0xff]   ;;  %v2856_v57 = vld [vmem:[#allocation8 + $0xc0] ss:$12 sps:$4 sm:$0xff]  }
 0x162   :  { %1188 = vmatpush1.bf16.msra.mxu0 %v2796_v61  ;;  %1270 = vmatpush1.bf16.msra.mxu1 %v2799_v62  ;;  %v2866_v61 = vld [vmem:[#allocation8 + $0xf0] ss:$12 sps:$4 sm:$0xff]   ;;  %v2873_v62 = vld [vmem:[#allocation8 + $0x10c] ss:$12 sps:$4 sm:$0xff]  }
 0x163   :  { %1189 = vmatprep.subr.bf16.mxu0 %v2804_v63  ;;  %1271 = vmatprep.subr.bf16.mxu1 %v2807_v2  ;;  %v2871_v63 = vld [vmem:[#allocation8 + $0x108] ss:$12 sps:$4 sm:$0xff]   ;;  %v2878_v2 = vld [vmem:[#allocation8 + $0x124] ss:$12 sps:$4 sm:$0xff]  }
 0x166   :  { %1190 = vmatpush1.bf16.msra.mxu0 %v2802_v3  ;;  %1272 = vmatpush1.bf16.msra.mxu1 %v2805_v4  ;;  %v2876_v3 = vld [vmem:[#allocation8 + $0x120] ss:$12 sps:$4 sm:$0xff]   ;;  %v2883_v4 = vld [vmem:[#allocation8 + $0x13c] ss:$12 sps:$4 sm:$0xff]  }
 0x167   :  { %1191 = vmatprep.subr.bf16.mxu0 %v2810_v5  ;;  %1273 = vmatprep.subr.bf16.mxu1 %v2813_v6  ;;  %v2881_v5 = vld [vmem:[#allocation8 + $0x138] ss:$12 sps:$4 sm:$0xff]   ;;  %v2888_v6 = vld [vmem:[#allocation8 + $0x154] ss:$12 sps:$4 sm:$0xff]  }
 0x16a   :  { %1192 = vmatpush1.bf16.msra.mxu0 %v2808_v1  ;;  %1274 = vmatpush1.bf16.msra.mxu1 %v2811_v8  ;;  %v2889_v1 = vld [vmem:[#allocation8 + $0x158] ss:$12 sps:$4 sm:$0xff]   ;;  %v2886_v8 = vld [vmem:[#allocation8 + $0x150] ss:$12 sps:$4 sm:$0xff]  }
 0x16b   :  { %1193 = vmatprep.subr.bf16.mxu0 %v2816_v9  ;;  %1275 = vmatprep.subr.bf16.mxu1 %v2819_v10  ;;  %v2890_v9 = vld [vmem:[#allocation8 + $0x98] ss:$12 sps:$4 sm:$0xff]  }
 0x16c   :  { %v2893_v10 = vld [vmem:[#allocation8 + $0x16c] ss:$12 sps:$4 sm:$0xff]  }
 0x16e   :  { %1194 = vmatpush1.bf16.msra.mxu0 %v2814_v12  ;;  %1276 = vmatpush1.bf16.msra.mxu1 %v2817_v13  ;;  %v2891_v12 = vld [vmem:[#allocation8 + $0x168] ss:$12 sps:$4 sm:$0xff]   ;;  %v2895_v13 = vld [vmem:[#allocation8 + $0xb0] ss:$12 sps:$4 sm:$0xff]  }
 0x16f   :  { %1195 = vmatprep.subr.bf16.mxu0 %v2822_v14  ;;  %1277 = vmatprep.subr.bf16.mxu1 %v2825_v15  ;;  %v2898_v14 = vld [vmem:[#allocation8 + $0x184] ss:$12 sps:$4 sm:$0xff]   ;;  %v2899_v15 = vld [vmem:[#allocation8 + $0x248] ss:$12 sps:$4 sm:$0xff]  }
 0x172   :  { %1196 = vmatpush1.bf16.msra.mxu0 %v2820_v17  ;;  %1278 = vmatpush1.bf16.msra.mxu1 %v2823_v18  ;;  %v656_v17 = vsub.s32 3, %v3260_v33  ;;  %v645_v18 = vrot.slane %v3287_v16, %v3263_v34 }
 0x173   :  { %1197 = vmatprep.subr.bf16.mxu0 %v2828_v19  ;;  %1279 = vmatprep.subr.bf16.mxu1 %v2831_v20  ;;  %v649_v19 = vrot.slane %v3287_v16, %v3271_v36 }
 0x174   :  { %v657_v20 = vrot.slane %v3287_v16, %v656_v17  ;;  %v2942_v17 = vld [vmem:[#allocation8 + $0x270] ss:$12 sps:$4 sm:$0xff]  }
 0x176   :  { %1198 = vmatpush1.bf16.msra.mxu0 %v2826_v22  ;;  %1280 = vmatpush1.bf16.msra.mxu1 %v2829_v23 }
 0x177   :  { %1842 = vmatprep.subr.bf16.mxu0 %v2834_v24  ;;  %2508 = vmatprep.subr.bf16.mxu1 %v2859_v25 }
 0x179   :  { %1216 = vmatmul.mubr.bf16.vlgmr.msra.gmra.mrb[4].mxu0 %v640_v26  ;;  %1298 = vmatmul.mubr.bf16.vlgmr.msra.gmra.mrb[4].mxu1 %v640_v26 }
 0x17a   :  { %1843 = vmatpush1.bf16.msra.mxu0 %v2832_v27  ;;  %2509 = vmatpush3.bf16.msra.mxu1 %v2860_v28 }
 0x17b   :  { %1844 = vmatprep.subr.bf16.mxu0 %v2837_v29  ;;  %2510 = vmatprep.subr.bf16.mxu1 %v2864_v30 }
 0x17e   :  { %1845 = vmatpush1.bf16.msra.mxu0 %v2835_v31  ;;  %2511 = vmatpush3.bf16.msra.mxu1 %v2865_v32 }
 0x17f   :  { %1846 = vmatprep.subr.bf16.mxu0 %v2840_v35  ;;  %2512 = vmatprep.subr.bf16.mxu1 %v2869_v37 }
 0x182   :  { %1847 = vmatpush1.bf16.msra.mxu0 %v2838_v38  ;;  %2513 = vmatpush3.bf16.msra.mxu1 %v2870_v39  ;;  %v2896_v38 = vld [vmem:[#allocation8 + $0x180] ss:$12 sps:$4 sm:$0xff]   ;;  %v2900_v39 = vld [vmem:[#allocation8 + $0x188] ss:$12 sps:$4 sm:$0xff]  }
 0x183   :  { %1848 = vmatprep.subr.bf16.mxu0 %v2843_v40  ;;  %2514 = vmatprep.subr.bf16.mxu1 %v2874_v41  ;;  %v2903_v41 = vld [vmem:[#allocation8 + $0x19c] ss:$12 sps:$4 sm:$0xff]  }
 0x186   :  { %1849 = vmatpush1.bf16.msra.mxu0 %v2841_v42  ;;  %2515 = vmatpush3.bf16.msra.mxu1 %v2875_v43  ;;  %v2904_v42 = vld [vmem:[#allocation8 + $0x260] ss:$12 sps:$4 sm:$0xff]  }
 0x187   :  { %1850 = vmatprep.subr.bf16.mxu0 %v2846_v44  ;;  %2516 = vmatprep.subr.bf16.mxu1 %v2879_v45  ;;  %v2901_v44 = vld [vmem:[#allocation8 + $0x198] ss:$12 sps:$4 sm:$0xff]   ;;  %v2905_v45 = vld [vmem:[#allocation8 + $0x1a0] ss:$12 sps:$4 sm:$0xff]  }
 0x18a   :  { %1851 = vmatpush1.bf16.msra.mxu0 %v2844_v46  ;;  %2517 = vmatpush3.bf16.msra.mxu1 %v2880_v47  ;;  %v2908_v46 = vld [vmem:[#allocation8 + $0x1b4] ss:$12 sps:$4 sm:$0xff]   ;;  %v2909_v47 = vld [vmem:[#allocation8 + $0x278] ss:$12 sps:$4 sm:$0xff]  }
 0x18b   :  { %1852 = vmatprep.subr.bf16.mxu0 %v2849_v48  ;;  %2518 = vmatprep.subr.bf16.mxu1 %v2884_v49  ;;  %v2906_v48 = vld [vmem:[#allocation8 + $0x1b0] ss:$12 sps:$4 sm:$0xff]   ;;  %v2910_v49 = vld [vmem:[#allocation8 + $0x1b8] ss:$12 sps:$4 sm:$0xff]  }
 0x18e   :  { %1853 = vmatpush1.bf16.msra.mxu0 %v2847_v50  ;;  %2519 = vmatpush3.bf16.msra.mxu1 %v2885_v51  ;;  %v2913_v50 = vld [vmem:[#allocation8 + $0x1cc] ss:$12 sps:$4 sm:$0xff]   ;;  %v2914_v51 = vld [vmem:[#allocation8 + $0x290] ss:$12 sps:$4 sm:$0xff]  }
 0x18f   :  { %1854 = vmatprep.subr.bf16.mxu0 %v2852_v52  ;;  %2520 = vmatprep.subr.bf16.mxu1 %v2889_v1  ;;  %v2911_v52 = vld [vmem:[#allocation8 + $0x1c8] ss:$12 sps:$4 sm:$0xff]   ;;  %v2934_v1 = vld [vmem:[#allocation8 + $0x2f0] ss:$12 sps:$4 sm:$0xff]  }
 0x192   :  { %1855 = vmatpush1.bf16.msra.mxu0 %v2850_v53  ;;  %2521 = vmatpush3.bf16.msra.mxu1 %v2890_v9  ;;  %v2915_v53 = vld [vmem:[#allocation8 + $0x1d0] ss:$12 sps:$4 sm:$0xff]  }
 0x193   :  { %1856 = vmatprep.subr.bf16.mxu0 %v2855_v54  ;;  %2522 = vmatprep.subr.bf16.mxu1 %v2894_v11  ;;  %v2918_v54 = vld [vmem:[#allocation8 + $0x1e4] ss:$12 sps:$4 sm:$0xff]  }
 0x194   :  { %v2935_v9 = vld [vmem:[#allocation8 + $0x230] ss:$12 sps:$4 sm:$0xff]  }
 0x195   :  { %v2938_v11 = vld [vmem:[#allocation8 + $0x244] ss:$12 sps:$4 sm:$0xff]  }
 0x196   :  { %1857 = vmatpush1.bf16.msra.mxu0 %v2853_v55  ;;  %2523 = vmatpush3.bf16.msra.mxu1 %v2895_v13  ;;  %v2919_v55 = vld [vmem:[#allocation8 + $0x2a8] ss:$12 sps:$4 sm:$0xff]  }
 0x197   :  { %1858 = vmatprep.subr.bf16.mxu0 %v2858_v56  ;;  %2530 = vmatprep.subr.bf16.mxu1 %v2899_v15  ;;  %v2916_v56 = vld [vmem:[#allocation8 + $0x1e0] ss:$12 sps:$4 sm:$0xff]   ;;  %v2939_v15 = vld [vmem:[#allocation8 + $0x258] ss:$12 sps:$4 sm:$0xff]  }
 0x19a   :  { %1859 = vmatpush1.bf16.msra.mxu0 %v2856_v57  ;;  %v2920_v57 = vld [vmem:[#allocation8 + $0x1e8] ss:$12 sps:$4 sm:$0xff]  }
 0x19b   :  { %1860 = vmatprep.subr.bf16.mxu0 %v2863_v58  ;;  %v2923_v58 = vld [vmem:[#allocation8 + $0x1fc] ss:$12 sps:$4 sm:$0xff]  }
 0x19e   :  { %1861 = vmatpush1.bf16.msra.mxu0 %v2861_v59  ;;  %v2924_v59 = vld [vmem:[#allocation8 + $0x2c0] ss:$12 sps:$4 sm:$0xff]  }
 0x19f   :  { %1862 = vmatprep.subr.bf16.mxu0 %v2868_v60  ;;  %v2921_v60 = vld [vmem:[#allocation8 + $0x1f8] ss:$12 sps:$4 sm:$0xff]  }
 0x1a2   :  { %1863 = vmatpush1.bf16.msra.mxu0 %v2866_v61  ;;  %v2925_v61 = vld [vmem:[#allocation8 + $0x200] ss:$12 sps:$4 sm:$0xff]  }
 0x1a3   :  { %1864 = vmatprep.subr.bf16.mxu0 %v2873_v62  ;;  %v653_v62 = vrot.slane %v3287_v16, %v3280_v7  ;;  %v2944_v16 = vld [vmem:[#allocation8 + $0x274] ss:$12 sps:$4 sm:$0xff]  }
 0x1a6   :  { %1865 = vmatpush1.bf16.msra.mxu0 %v2871_v63  ;;  %v2928_v63 = vld [vmem:[#allocation8 + $0x214] ss:$12 sps:$4 sm:$0xff]  }
 0x1a7   :  { %1866 = vmatprep.subr.bf16.mxu0 %v2878_v2  ;;  %v2929_v2 = vld [vmem:[#allocation8 + $0x2d8] ss:$12 sps:$4 sm:$0xff]  }
 0x1aa   :  { %1867 = vmatpush1.bf16.msra.mxu0 %v2876_v3  ;;  %v2926_v3 = vld [vmem:[#allocation8 + $0x210] ss:$12 sps:$4 sm:$0xff]  }
 0x1ab   :  { %1868 = vmatprep.subr.bf16.mxu0 %v2883_v4  ;;  %v2930_v4 = vld [vmem:[#allocation8 + $0x218] ss:$12 sps:$4 sm:$0xff]  }
 0x1ae   :  { %1869 = vmatpush1.bf16.msra.mxu0 %v2881_v5 }
 0x1af   :  { %1870 = vmatprep.subr.bf16.mxu0 %v2888_v6  ;;  %v2933_v6 = vld [vmem:[#allocation8 + $0x22c] ss:$12 sps:$4 sm:$0xff]  }
 0x1b2   :  { %1871 = vmatpush1.bf16.msra.mxu0 %v2886_v8  ;;  %v2931_v8 = vld [vmem:[#allocation8 + $0x228] ss:$12 sps:$4 sm:$0xff]  }
 0x1b3   :  { %1872 = vmatprep.subr.bf16.mxu0 %v2893_v10 }
 0x1b6   :  { %1873 = vmatpush1.bf16.msra.mxu0 %v2891_v12  ;;  %v2936_v12 = vld [vmem:[#allocation8 + $0x240] ss:$12 sps:$4 sm:$0xff]  }
 0x1b7   :  { %1883 = vmatprep.subr.bf16.mxu0 %v2898_v14  ;;  %v2941_v14 = vld [vmem:[#allocation8 + $0x25c] ss:$12 sps:$4 sm:$0xff]  }
 0x24c   :  { %v1217_v21 = vpop.f32.mrb[4].mxu0  ;;  %v3295_v22 = vpop.f32.mrb[4].mxu1 }
 0x24d   :  { %v2623_v23 = vadd.f32 %v1217_v21, %v645_v18  ;;  %v1219_v24 = vpop.f32.mrb[5].mxu0  ;;  %v1301_v25 = vpop.f32.mrb[5].mxu1  ;;  %v2625_v5 = vadd.f32 %v3295_v22, %v653_v62  ;;  %v2947_v18 = vld [vmem:[#allocation8 + $0x28c] ss:$12 sps:$4 sm:$0xff]   ;;  %v2953_v22 = vld [vmem:[#allocation8 + $0x2bc] ss:$12 sps:$4 sm:$0xff]  }
 0x24e   :  { %v2624_v26 = vadd.f32 %v1219_v24, %v649_v19  ;;  %v2626_v27 = vadd.f32 %v1301_v25, %v657_v20  ;;  %v1221_v28 = vpop.f32.mrb[6].mxu0  ;;  %v1303_v29 = vpop.f32.mrb[6].mxu1  ;;  %v2945_v19 = vld [vmem:[#allocation8 + $0x288] ss:$12 sps:$4 sm:$0xff]   ;;  %v2950_v20 = vld [vmem:[#allocation8 + $0x2a4] ss:$12 sps:$4 sm:$0xff]  }
 0x24f   :  { %v1306_v30 = vmax.f32 %v2623_v23, 0.0  ;;  %v1222_v33 = vpop.f32.mrb[7].mxu0  ;;  %v1304_v31 = vpop.f32.mrb[7].mxu1  ;;  %v1308_v10 = vmax.f32 %v2625_v5, 0.0  ;;  %v2948_v21 = vld [vmem:[#allocation8 + $0x2a0] ss:$12 sps:$4 sm:$0xff]  }
 0x250   :  { %v1307_v32 = vmax.f32 %v2624_v26, 0.0  ;;  %v1309_v35 = vmax.f32 %v2626_v27, 0.0  ;;  %v2951_v23 = vld [vmem:[#allocation8 + $0x2b8] ss:$12 sps:$4 sm:$0xff]   ;;  %v2956_v24 = vld [vmem:[#allocation8 + $0x2d4] ss:$12 sps:$4 sm:$0xff]  }
 0x251   :  { %v1310_v40 = vpack.c.bf16 %v1306_v30, %v1306_v30  ;;  %v1312_v13 = vpack.c.bf16 %v1308_v10, %v1308_v10  ;;  %v2954_v25 = vld [vmem:[#allocation8 + $0x2d0] ss:$12 sps:$4 sm:$0xff]   ;;  %v2959_v26 = vld [vmem:[#allocation8 + $0x2ec] ss:$12 sps:$4 sm:$0xff]   ;;  %v2957_v27 = vld [vmem:[#allocation8 + $0x2e8] ss:$12 sps:$4 sm:$0xff]  }
 0x252   :  { %v1311_v37 = vpack.c.bf16 %v1307_v32, %v1307_v32  ;;  %v1313_v43 = vpack.c.bf16 %v1309_v35, %v1309_v35  ;;  %v2960_v28 = vld [vmem:[#allocation10 + $0x40] sm:$0xff]   ;;  %v2962_v30 = vld [vmem:[#allocation10 + $0x48] sm:$0xff]   ;;  %v2964_v31 = vld [vmem:[#allocation10 + $0x50] sm:$0xff]  }
 0x253   :  { %v2961_v29 = vld [vmem:[#allocation10] sm:$0xff]   ;;  %v2963_v33 = vld [vmem:[#allocation10 + $0x8] sm:$0xff]   ;;  %v2965_v32 = vld [vmem:[#allocation10 + $0x10] sm:$0xff]  }
 0x254   :  { %1874 = vmatprep.mubr.bf16.mxu0 %v1311_v37  ;;  %1956 = vmatprep.mubr.bf16.mxu1 %v1311_v37  ;;  %v2966_v35 = vld [vmem:[#allocation10 + $0x58] sm:$0xff]   ;;  %v2977_v10 = vld [vmem:[#allocation10 + $0x88] sm:$0xff]  }
 0x255   :  { %1875 = vmatmul.mubr.bf16.vlgmr.msra.gmra.mrb[8].mxu0 %v1310_v40  ;;  %1957 = vmatmul.mubr.bf16.vlgmr.msra.gmra.mrb[8].mxu1 %v1310_v40  ;;  %v2967_v37 = vld [vmem:[#allocation10 + $0x18] sm:$0xff]   ;;  %v2970_v40 = vld [vmem:[#allocation10 + $0x68] sm:$0xff]  }
 0x256   :  { %1884 = vmatpush1.bf16.msra.mxu0 %v2896_v38  ;;  %2531 = vmatpush3.bf16.msra.mxu1 %v2900_v39  ;;  %v2968_v38 = vld [vmem:[#allocation10 + $0x60] sm:$0xff]  }
 0x257   :  { %1915 = vmatprep.mubr.bf16.mxu0 %v1313_v43  ;;  %1996 = vmatprep.mubr.bf16.mxu1 %v1313_v43  ;;  %v2969_v39 = vld [vmem:[#allocation10 + $0x20] sm:$0xff]   ;;  %v2973_v43 = vld [vmem:[#allocation10 + $0x30] sm:$0xff]  }
 0x258   :  { %1885 = vmatprep.subr.bf16.mxu0 %v2903_v41  ;;  %2532 = vmatprep.subr.bf16.mxu1 %v2904_v42  ;;  %v2971_v41 = vld [vmem:[#allocation10 + $0x28] sm:$0xff]   ;;  %v2972_v42 = vld [vmem:[#allocation10 + $0x70] sm:$0xff]  }
 0x25a   :  { %1886 = vmatpush1.bf16.msra.mxu0 %v2901_v44  ;;  %2533 = vmatpush3.bf16.msra.mxu1 %v2905_v45  ;;  %v2974_v44 = vld [vmem:[#allocation10 + $0x78] sm:$0xff]  }
 0x25b   :  { %1887 = vmatprep.subr.bf16.mxu0 %v2908_v46  ;;  %2534 = vmatprep.subr.bf16.mxu1 %v2909_v47  ;;  %v2975_v45 = vld [vmem:[#allocation10 + $0x38] sm:$0xff]  }
 0x25e   :  { %1888 = vmatpush1.bf16.msra.mxu0 %v2906_v48  ;;  %2535 = vmatpush3.bf16.msra.mxu1 %v2910_v49 }
 0x25f   :  { %1889 = vmatprep.subr.bf16.mxu0 %v2913_v50  ;;  %2536 = vmatprep.subr.bf16.mxu1 %v2914_v51  ;;  %v358_v51 = vld [vmem:[%s3337_s6] sm:$0x7] }
 0x262   :  { %1890 = vmatpush1.bf16.msra.mxu0 %v2911_v52  ;;  %2537 = vmatpush3.bf16.msra.mxu1 %v2915_v53  ;;  %v1326_v52 = vrot.slane %v358_v51, %v3280_v7 }
 0x263   :  { %1891 = vmatprep.subr.bf16.mxu0 %v2918_v54  ;;  %2538 = vmatprep.subr.bf16.mxu1 %v2919_v55 }
 0x266   :  { %1892 = vmatpush1.bf16.msra.mxu0 %v2916_v56  ;;  %2539 = vmatpush3.bf16.msra.mxu1 %v2920_v57 }
 0x267   :  { %1893 = vmatprep.subr.bf16.mxu0 %v2923_v58  ;;  %2540 = vmatprep.subr.bf16.mxu1 %v2924_v59 }
 0x26a   :  { %1894 = vmatpush1.bf16.msra.mxu0 %v2921_v60  ;;  %2541 = vmatpush3.bf16.msra.mxu1 %v2925_v61  ;;  %v1318_v60 = vrot.slane %v358_v51, %v3263_v34  ;;  %v1322_v61 = vrot.slane %v358_v51, %v3271_v36  ;;  %v2978_v34 = vld [vmem:[#allocation10 + $0x90] sm:$0xff]   ;;  %v2979_v36 = vld [vmem:[#allocation10 + $0x98] sm:$0xff]  }
 0x26b   :  { %1895 = vmatprep.subr.bf16.mxu0 %v2928_v63  ;;  %2542 = vmatprep.subr.bf16.mxu1 %v2929_v2 }
 0x26e   :  { %1896 = vmatpush1.bf16.msra.mxu0 %v2926_v3  ;;  %2543 = vmatpush3.bf16.msra.mxu1 %v2930_v4 }
 0x26f   :  { %1897 = vmatprep.subr.bf16.mxu0 %v2933_v6  ;;  %2544 = vmatprep.subr.bf16.mxu1 %v2934_v1 }
 0x272   :  { %1898 = vmatpush1.bf16.msra.mxu0 %v2931_v8  ;;  %2545 = vmatpush3.bf16.msra.mxu1 %v2935_v9  ;;  %v2976_v8 = vld [vmem:[#allocation10 + $0x80] sm:$0xff]  }
 0x273   :  { %1899 = vmatprep.subr.bf16.mxu0 %v2938_v11  ;;  %2552 = vmatprep.subr.bf16.mxu1 %v2960_v28  ;;  %v2980_v11 = vld [vmem:[#allocation10 + $0xa0] sm:$0xff]  }
 0x275   :  { %1997 = vmatmul.mubr.bf16.vlgmr.msra.gmra.mrb[12].mxu1 %v1312_v13 }
 0x276   :  { %1900 = vmatpush1.bf16.msra.mxu0 %v2936_v12  ;;  %2553 = vmatpush3.bf16.msra.mxu1 %v2961_v29  ;;  %v2981_v12 = vld [vmem:[#allocation10 + $0xa8] sm:$0xff]  }
 0x277   :  { %1901 = vmatprep.subr.bf16.mxu0 %v2941_v14  ;;  %2554 = vmatprep.subr.bf16.mxu1 %v2962_v30  ;;  %v2983_v14 = vld [vmem:[#allocation10 + $0xb8] sm:$0xff]  }
 0x27a   :  { %1902 = vmatpush1.bf16.msra.mxu0 %v2939_v15  ;;  %2555 = vmatpush3.bf16.msra.mxu1 %v2963_v33 }
 0x27b   :  { %1903 = vmatprep.subr.bf16.mxu0 %v2944_v16  ;;  %2556 = vmatprep.subr.bf16.mxu1 %v2964_v31 }
 0x27e   :  { %1904 = vmatpush1.bf16.msra.mxu0 %v2942_v17  ;;  %2557 = vmatpush3.bf16.msra.mxu1 %v2965_v32 }
 0x27f   :  { %1905 = vmatprep.subr.bf16.mxu0 %v2947_v18  ;;  %2558 = vmatprep.subr.bf16.mxu1 %v2966_v35 }
 0x282   :  { %1906 = vmatpush1.bf16.msra.mxu0 %v2945_v19  ;;  %2559 = vmatpush3.bf16.msra.mxu1 %v2967_v37 }
 0x283   :  { %1907 = vmatprep.subr.bf16.mxu0 %v2950_v20  ;;  %2560 = vmatprep.subr.bf16.mxu1 %v2968_v38 }
 0x286   :  { %1908 = vmatpush1.bf16.msra.mxu0 %v2948_v21  ;;  %2561 = vmatpush3.bf16.msra.mxu1 %v2969_v39 }
 0x287   :  { %1909 = vmatprep.subr.bf16.mxu0 %v2953_v22  ;;  %2562 = vmatprep.subr.bf16.mxu1 %v2970_v40  ;;  %v2474_v22 = vld [vmem:[%s3339_s8] ss:$0 sm:$0xff] }
 0x28a   :  { %1910 = vmatpush1.bf16.msra.mxu0 %v2951_v23  ;;  %2563 = vmatpush3.bf16.msra.mxu1 %v2971_v41 }
 0x28b   :  { %1911 = vmatprep.subr.bf16.mxu0 %v2956_v24  ;;  %2564 = vmatprep.subr.bf16.mxu1 %v2972_v42 }
 0x28e   :  { %1912 = vmatpush1.bf16.msra.mxu0 %v2954_v25  ;;  %2565 = vmatpush3.bf16.msra.mxu1 %v2973_v43 }
 0x28f   :  { %1913 = vmatprep.subr.bf16.mxu0 %v2959_v26  ;;  %2566 = vmatprep.subr.bf16.mxu1 %v2974_v44 }
 0x292   :  { %1914 = vmatpush1.bf16.msra.mxu0 %v2957_v27  ;;  %2567 = vmatpush3.bf16.msra.mxu1 %v2975_v45 }
 0x293   :  { %2603 = vmatprep.subr.bf16.mxu1 %v3135_v0 }
 0x295   :  { %1916 = vmatmul.mubr.bf16.vlgmr.msra.gmra.mrb[8].mxu0 %v1312_v13  ;;  %v2982_v13 = vld [vmem:[#allocation10 + $0xb0] sm:$0xff]  }
 0x328   :  { %v2524_v46 = vpop.f32.mrb[8].mxu1 }
 0x329   :  { %v2525_v47 = vpop.f32.mrb[9].mxu1 }
 0x32a   :  { %v2526_v48 = vadd.f32 %v2525_v47, %v2524_v46  ;;  %v2527_v49 = vpop.f32.mrb[10].mxu1 }
 0x32b   :  { %v2528_v50 = vpop.f32.mrb[11].mxu1 }
 0x32c   :  { %v1959_v55 = vadd.f32 %v2526_v48, %v1326_v52 }
 0x348   :  { %v2546_v53 = vpop.f32.mrb[12].mxu1 }
 0x349   :  { %v2547_v54 = vpop.f32.mrb[13].mxu1 }
 0x34a   :  { %v2548_v56 = vadd.f32 %v2547_v54, %v2546_v53  ;;  %v2549_v57 = vpop.f32.mrb[14].mxu1 }
 0x34b   :  { %v2550_v58 = vpop.f32.mrb[15].mxu1 }
 0x34c   :  { %v1999_v59 = vadd.f32 %v2548_v56, %v1959_v55 }
 0x34e   :  { %v2006_v15 = vmax.f32 %v1999_v59, 0.0 }
 0x350   :  { %v2009_v16 = vpack.c.bf16 %v2006_v15, %v2006_v15 }
 0x368   :  { %v1917_v62 = vpop.f32.mrb[8].mxu0 }
 0x369   :  { %v2627_v63 = vadd.f32 %v1917_v62, %v1318_v60  ;;  %v1919_v2 = vpop.f32.mrb[9].mxu0 }
 0x36a   :  { %v2628_v3 = vadd.f32 %v1919_v2, %v1322_v61  ;;  %v1921_v4 = vpop.f32.mrb[10].mxu0 }
 0x36b   :  { %v2004_v5 = vmax.f32 %v2627_v63, 0.0  ;;  %v1922_v6 = vpop.f32.mrb[11].mxu0 }
 0x36c   :  { %v2005_v1 = vmax.f32 %v2628_v3, 0.0 }
 0x36d   :  { %v2007_v9 = vpack.c.bf16 %v2004_v5, %v2004_v5 }
 0x36e   :  { %v2008_v7 = vpack.c.bf16 %v2005_v1, %v2005_v1 }
 0x370   :  { %2192 = vmatprep.mubr.bf16.mxu1 %v2008_v7 }
 0x371   :  { %2193 = vmatmul.mubr.bf16.vlgmr.msra.gmra.mrb[16].mxu1 %v2007_v9 }
 0x372   :  { %2604 = vmatpush3.bf16.msra.mxu1 %v2976_v8  ;;  %2619 = vmatprep.mubr.msk.bf16.mxu1 %vm3137_vm0, %v3135_v0 }
 0x373   :  { %2605 = vmatprep.subr.bf16.mxu1 %v3135_v0 }
 0x376   :  { %2606 = vmatpush3.bf16.msra.mxu1 %v2977_v10 }
 0x377   :  { %2607 = vmatprep.subr.bf16.mxu1 %v3135_v0 }
 0x37a   :  { %2608 = vmatpush3.bf16.msra.mxu1 %v2978_v34 }
 0x37b   :  { %2609 = vmatprep.subr.bf16.mxu1 %v3135_v0 }
 0x37e   :  { %2610 = vmatpush3.bf16.msra.mxu1 %v2979_v36 }
 0x37f   :  { %2611 = vmatprep.subr.bf16.mxu1 %v3135_v0 }
 0x382   :  { %2612 = vmatpush3.bf16.msra.mxu1 %v2980_v11 }
 0x383   :  { %2613 = vmatprep.subr.bf16.mxu1 %v3135_v0 }
 0x386   :  { %2614 = vmatpush3.bf16.msra.mxu1 %v2981_v12 }
 0x387   :  { %2615 = vmatprep.subr.bf16.mxu1 %v3135_v0 }
 0x38a   :  { %2616 = vmatpush3.bf16.msra.mxu1 %v2982_v13 }
 0x38b   :  { %2617 = vmatprep.subr.bf16.mxu1 %v3135_v0 }
 0x38e   :  { %2618 = vmatpush3.bf16.msra.mxu1 %v2983_v14 }
 0x391   :  { %2620 = vmatmul.mubr.bf16.vlgmr.msra.gmra.mrb[20].mxu1 %v2009_v16 }
 0x444   :  { %v2568_v17 = vpop.f32.mrb[16].mxu1 }
 0x445   :  { %v2569_v18 = vpop.f32.mrb[17].mxu1 }
 0x446   :  { %v2570_v19 = vadd.f32 %v2569_v18, %v2568_v17  ;;  %v2571_v20 = vpop.f32.mrb[18].mxu1 }
 0x447   :  { %v2572_v21 = vpop.f32.mrb[19].mxu1 }
 0x448   :  { %v2195_v23 = vadd.f32 %v2570_v19, %v2474_v22 }
 0x464   :  { %v2234_v24 = vpop.f32.mrb[20].mxu1 }
 0x465   :  { %v2235_v25 = vadd.f32 %v2234_v24, %v2195_v23  ;;  %v2621_v26 = vpop.f32.mrb[21].mxu1 }
 0x466   :  { %v2237_v0 = vpop.f32.mrb[22].mxu1 }
 0x467   :  { %2240 = vst [vmem:[#allocation11] sm:$0xff] %v2235_v25  ;;  %v2622_v27 = vpop.f32.mrb[23].mxu1 }
 0x468   :  { %3105 = shalt.err (!%p3102_p2)
}
 0x469   :  { %s3106_s8 = scalar_lea.hbm %s3340_s9, 128 }
 0x46a   :  { %p3107_p3 = scmp.ne.s32.totalorder %s3340_s9, %s3106_s8  ;;  %p3110_p4 = scmp.lt.u32.totalorder %s3106_s8, %s3340_s9 }
 0x46c   :  { %p3112_p5 = pnand %p3110_p4, %p3107_p3 }
 0x46e   :  { %3115 = shalt.err (!%p3112_p5)
}
 0x46f   :  { %2250 = dma.vmem_to_hbm [thread:$0]  %s2248_s13, 128, %s3340_s9, [#allocation4]  }
 0x470   :  { %3122 = dma.done.wait [#allocation4], 128  }
 0x471   :  { %3123 = vsyncadd [#allocation4], 4294967168 }
 0x472   :  { %2254 = vsyncpa [#allocation3], 1 }
 0x473   :  { %2255 = vsyncpa [#allocation6], 1 }
 0x474   :  { %2256 = vsyncpa [#allocation9], 1 }
 0x475   :  { %2257 = vsyncpa [#allocation4], 1 }

</bundles_post_ra>
